<compile_context>
chip_gen: v5e
topology: v5e:2x2
jax: 0.10.0
libtpu: 0.0.40
codegen_flags: <defaults>
</compile_context>

<pallas_src>
import math

import jax
import jax.numpy as jnp
from jax.experimental import pallas as pl
from jax.experimental.pallas import tpu as pltpu

_TINY = 1.0 / (1 << 24)  # guard against amax == 0 (output forced to 0)


# ---------------------------------------------------------------------------
# Kernel bodies.
# ---------------------------------------------------------------------------
def _fq(x, scale, dequant):
    """clamp(round(x*scale)) * dequant  (dequant==0 encodes the amax==0 case)."""
    return jnp.clip(jnp.round(x * scale), -128.0, 127.0) * dequant


def _qc_kernel_sublane(scale_ref, dequant_ref, x0_ref, x1_ref, o_ref):
    """Concat on the sublane (second-minor) axis: blocks (TR, c_i, TI)."""
    c0 = x0_ref.shape[1]
    q0 = _fq(x0_ref[...].astype(jnp.float32), scale_ref[0], dequant_ref[0])
    q1 = _fq(x1_ref[...].astype(jnp.float32), scale_ref[1], dequant_ref[1])
    o_ref[:, :c0, :] = q0.astype(o_ref.dtype)
    o_ref[:, c0:, :] = q1.astype(o_ref.dtype)


def _qc_kernel_lane(scale_ref, dequant_ref, x0_ref, x1_ref, o_ref):
    """Concat on the lane (minor) axis: blocks (TR, c_i*inner), 128-aligned."""
    k0 = x0_ref.shape[1]
    q0 = _fq(x0_ref[...].astype(jnp.float32), scale_ref[0], dequant_ref[0])
    q1 = _fq(x1_ref[...].astype(jnp.float32), scale_ref[1], dequant_ref[1])
    o_ref[:, :k0] = q0.astype(o_ref.dtype)
    o_ref[:, k0:] = q1.astype(o_ref.dtype)


# ---------------------------------------------------------------------------
# Generation-aware VMEM / tile budgets.
# ---------------------------------------------------------------------------
def _vmem_budget():
    """Return (vmem_limit_bytes, target block-set bytes per grid step)."""
    cap = None
    try:
        info = pltpu.get_tpu_info()
        cap = getattr(info, "vmem_capacity_bytes", None)
    except Exception:
        cap = None
    if not cap:
        cap = 64 * 1024 * 1024  # conservative fallback (v7x per-core VMEM)
    cap = int(cap)
    # 128 MiB (v5e/v6e) -> 96 MiB limit / 24 MiB block-set;
    #  64 MiB (v7x)     -> 48 MiB limit / 12 MiB block-set.
    vmem_limit = max(32 * 1024 * 1024, min(96 * 1024 * 1024, (cap * 3) // 4))
    target_block_set = vmem_limit // 4  # double-buffered -> half the limit
    return int(vmem_limit), int(target_block_set)


def _pick_row_tile_lane(rows, k_per_row, itemsize, target_bytes):
    """Row tile for the lane-flattened 2-D path (multiple of 8 or full rows)."""
    per_row = 2 * k_per_row * itemsize          # inputs + output block bytes
    budget_rows = max(1, target_bytes // per_row)
    desired = min(rows, budget_rows)
    if rows >= 2:
        desired = min(desired, -(-rows // 2))   # keep >=2 grid steps (megacore)
    if desired >= rows:
        return rows
    if desired >= 8:
        return (desired // 8) * 8
    return rows if rows <= 8 else 8


def _pick_tiles_sublane(rows, c_total, inner, itemsize, target_bytes):
    """(TR, TI) for the 3-D sublane-concat path; pl.cdiv grid handles tails."""
    unit = 2 * c_total * itemsize               # bytes per (row x lane element)
    budget = max(128, target_bytes // unit)     # TR * TI element budget
    if inner <= budget:
        ti = inner                              # full extent (always legal)
    else:
        ti = min(inner, max(128, (budget // 128) * 128))
    tr = max(1, min(rows, budget // ti))
    if ti >= inner and rows >= 2:
        tr = min(tr, -(-rows // 2))             # keep >=2 grid steps (megacore)
    return tr, ti


# ---------------------------------------------------------------------------
# Wrapper.
# ---------------------------------------------------------------------------
def _scale_dequant(x, amax):
    if amax is None:
        amax = jnp.max(jnp.abs(x.astype(jnp.float32)))
    else:
        amax = jnp.max(jnp.abs(jnp.asarray(amax, dtype=jnp.float32)))
    safe = jnp.maximum(amax, jnp.float32(_TINY))
    scale = jnp.float32(127.0) / safe
    dequant = jnp.where(amax <= jnp.float32(_TINY),
                        jnp.float32(0.0), safe / jnp.float32(127.0))
    return scale, dequant


def quant_concat(x0, x1, dim, *, amax0=None, amax1=None):
    """Fake-quantize both inputs (per-tensor dynamic amax) and concat on `dim`.

    amax0 / amax1: optional precomputed (calibrated) per-tensor amax values;
    when supplied, the full-tensor amax reduction over that input is skipped.
    """
    dim = dim % x0.ndim
    assert x0.shape[:dim] == x1.shape[:dim]
    assert x0.shape[dim + 1:] == x1.shape[dim + 1:]
    assert x0.dtype == x1.dtype

    lead = x0.shape[:dim]
    tail = x0.shape[dim + 1:]
    rows = math.prod(lead)
    inner = math.prod(tail)
    c0 = x0.shape[dim]
    c1 = x1.shape[dim]
    c_total = c0 + c1
    itemsize = x0.dtype.itemsize

    # ---- Pass 1: per-tensor amax -> scalar quant / dequant factors. ----
    s0, d0 = _scale_dequant(x0, amax0)
    s1, d1 = _scale_dequant(x1, amax1)
    scales = jnp.stack([s0, s1])      # (2,) f32 -> SMEM
    dequants = jnp.stack([d0, d1])    # (2,) f32 -> SMEM

    vmem_limit, target_bytes = _vmem_budget()

    total_elems = x0.size + x1.size
    io_bytes = 2 * (x0.nbytes + x1.nbytes)  # quant-pass reads + output writes
    cost = pl.CostEstimate(flops=5 * total_elems, transcendentals=0,
                           bytes_accessed=io_bytes)

    # ---- Pass 2: streaming tiled fake-quant + concat. ----
    use_lane_path = (
        (c0 * inner) % 128 == 0
        and (c1 * inner) % 128 == 0
        and min(rows, 8) * 2 * c_total * inner * itemsize <= target_bytes
    )

    if use_lane_path:
        # Lane-flattened layout: concat offset c0*inner is 128-aligned, so
        # both output stores are unmasked, lane-dense vst.
        k0 = c0 * inner
        k1 = c1 * inner
        x0_2d = x0.reshape(rows, k0)
        x1_2d = x1.reshape(rows, k1)
        tr = _pick_row_tile_lane(rows, c_total * inner, itemsize, target_bytes)
        grid = (pl.cdiv(rows, tr),)
        out_2d = pl.pallas_call(
            _qc_kernel_lane,
            out_shape=jax.ShapeDtypeStruct((rows, k0 + k1), x0.dtype),
            grid=grid,
            in_specs=[
                pl.BlockSpec(memory_space=pltpu.SMEM),   # scales (2,)
                pl.BlockSpec(memory_space=pltpu.SMEM),   # dequants (2,)
                pl.BlockSpec((tr, k0), lambda r: (r, 0)),
                pl.BlockSpec((tr, k1), lambda r: (r, 0)),
            ],
            out_specs=pl.BlockSpec((tr, k0 + k1), lambda r: (r, 0)),
            compiler_params=pltpu.CompilerParams(
                dimension_semantics=("parallel",),
                vmem_limit_bytes=vmem_limit,
            ),
            cost_estimate=cost,
        )(scales, dequants, x0_2d, x1_2d)
        return out_2d.reshape(lead + (c_total,) + tail)

    # Generic path: concat on the sublane axis of a 3-D view.
    x0_3d = x0.reshape(rows, c0, inner)
    x1_3d = x1.reshape(rows, c1, inner)
    tr, ti = _pick_tiles_sublane(rows, c_total, inner, itemsize, target_bytes)
    grid = (pl.cdiv(rows, tr), pl.cdiv(inner, ti))
    out_3d = pl.pallas_call(
        _qc_kernel_sublane,
        out_shape=jax.ShapeDtypeStruct((rows, c_total, inner), x0.dtype),
        grid=grid,
        in_specs=[
            pl.BlockSpec(memory_space=pltpu.SMEM),       # scales (2,)
            pl.BlockSpec(memory_space=pltpu.SMEM),       # dequants (2,)
            pl.BlockSpec((tr, c0, ti), lambda r, j: (r, 0, j)),
            pl.BlockSpec((tr, c1, ti), lambda r, j: (r, 0, j)),
        ],
        out_specs=pl.BlockSpec((tr, c_total, ti), lambda r, j: (r, 0, j)),
        compiler_params=pltpu.CompilerParams(
            dimension_semantics=("parallel", "parallel"),
            vmem_limit_bytes=vmem_limit,
        ),
        cost_estimate=cost,
    )(scales, dequants, x0_3d, x1_3d)
    return out_3d.reshape(lead + (c_total,) + tail)


# ---------------------------------------------------------------------------
# Pure-JAX reference (original q/scale formulation).
# ---------------------------------------------------------------------------
def _fake_quant_reference(x):
    amax = jnp.max(jnp.abs(x))
    safe = jnp.maximum(amax, _TINY)
    scale = 127.0 / safe
    q = jnp.clip(jnp.round(x * scale), -128.0, 127.0) / scale
    return jnp.where(amax <= _TINY, jnp.zeros_like(x), q)


def _reference(x0, x1, dim):
    return jnp.concatenate(
        [_fake_quant_reference(x0), _fake_quant_reference(x1)], axis=dim)


def _check(out, x0, x1, dim, tol=1e-5):
    ref = _reference(x0, x1, dim)
    assert out.shape == ref.shape, (out.shape, ref.shape)
    err = float(jnp.max(jnp.abs(out - ref)))
    assert jnp.allclose(out, ref, atol=tol, rtol=tol), err


if __name__ == "__main__":
    key = jax.random.PRNGKey(0)
    k0, k1, k2, k3, k4, k5, k6 = jax.random.split(key, 7)

    # 1) Small NCHW case consistent with the module (concat along channels);
    #    exercises the lane-flattened 2-D path (c0*inner = 1024, 128-aligned).
    x0 = jax.random.normal(k0, (2, 4, 16, 16), dtype=jnp.float32)
    x1 = jax.random.normal(k1, (2, 4, 16, 16), dtype=jnp.float32) * 2.0
    out = jax.block_until_ready(quant_concat(x0, x1, dim=1))
    _check(out, x0, x1, 1)

    # 2) Larger case, still lane-flattened path with a bigger block.
    y0 = jax.random.normal(k2, (2, 8, 64, 64), dtype=jnp.float32)
    y1 = jax.random.normal(k3, (2, 8, 64, 64), dtype=jnp.float32) * 0.5
    out2 = jax.block_until_ready(quant_concat(y0, y1, dim=1))
    _check(out2, y0, y1, 1)

    # 3) Non-128-divisible inner -> generic 3-D sublane path with cdiv row split.
    w0 = jax.random.normal(k4, (3, 8, 10, 20), dtype=jnp.float32)
    w1 = jax.random.normal(k5, (3, 8, 10, 20), dtype=jnp.float32) * 3.0
    out3 = jax.block_until_ready(quant_concat(w0, w1, dim=1))
    _check(out3, w0, w1, 1)

    # 4) Unequal channel counts, concat on an interior dim (3-D path).
    v0 = jax.random.normal(k6, (2, 3, 4, 16), dtype=jnp.float32)
    v1 = jax.random.normal(k0, (2, 3, 6, 16), dtype=jnp.float32) * 0.25
    out4 = jax.block_until_ready(quant_concat(v0, v1, dim=2))
    _check(out4, v0, v1, 2)

    # 5) Precomputed (calibrated) amax path + all-zero input (dequant == 0).
    z0 = jax.random.normal(k1, (2, 4, 8, 8), dtype=jnp.float32)
    z1 = jnp.zeros((2, 4, 8, 8), dtype=jnp.float32)
    out5 = jax.block_until_ready(
        quant_concat(z0, z1, dim=1,
                     amax0=jnp.max(jnp.abs(z0)), amax1=jnp.float32(0.0)))
    _check(out5, z0, z1, 1)

    print("KERNEL_OK")
</pallas_src>

<mosaic_0001>
module attributes {stable_mosaic.version = 11 : i64} {
  func.func @_qc_kernel_lane(%arg0: i32, %arg1: memref<2xf32, #tpu.memory_space<smem>>, %arg2: memref<2xf32, #tpu.memory_space<smem>>, %arg3: memref<2x1024xf32, #tpu.memory_space<vmem>>, %arg4: memref<2x1024xf32, #tpu.memory_space<vmem>>, %arg5: memref<2x2048xf32, #tpu.memory_space<vmem>>) attributes {dimension_semantics = [#tpu.dimension_semantics<parallel>], iteration_bounds = array<i64: 1>, scalar_prefetch = 0 : i64, scratch_operands = 0 : i64, tpu.core_type = #tpu.core_type<tc>, window_params = [{transform_indices = @transform_0, window_bounds = array<i64: 2>}, {transform_indices = @transform_1, window_bounds = array<i64: 2>}, {transform_indices = @transform_2, window_bounds = array<i64: 2, 1024>}, {transform_indices = @transform_3, window_bounds = array<i64: 2, 1024>}, {transform_indices = @transform_4, window_bounds = array<i64: 2, 2048>}]} {
    %c0 = arith.constant 0 : index
    %c0_0 = arith.constant 0 : index
    %0 = vector.load %arg3[%c0, %c0_0] : memref<2x1024xf32, #tpu.memory_space<vmem>>, vector<2x1024xf32>
    %c0_1 = arith.constant 0 : index
    %1 = memref.load %arg1[%c0_1] : memref<2xf32, #tpu.memory_space<smem>>
    %c0_2 = arith.constant 0 : index
    %2 = memref.load %arg2[%c0_2] : memref<2xf32, #tpu.memory_space<smem>>
    %3 = vector.broadcast %1 : f32 to vector<2x1024xf32>
    %4 = arith.mulf %0, %3 : vector<2x1024xf32>
    %5 = math.roundeven %4 : vector<2x1024xf32>
    %cst = arith.constant -1.280000e+02 : f32
    %cst_3 = arith.constant 1.270000e+02 : f32
    %6 = vector.broadcast %cst : f32 to vector<2x1024xf32>
    %7 = arith.maximumf %6, %5 : vector<2x1024xf32>
    %8 = vector.broadcast %cst_3 : f32 to vector<2x1024xf32>
    %9 = arith.minimumf %8, %7 : vector<2x1024xf32>
    %10 = vector.broadcast %2 : f32 to vector<2x1024xf32>
    %11 = arith.mulf %9, %10 : vector<2x1024xf32>
    %c0_4 = arith.constant 0 : index
    %c0_5 = arith.constant 0 : index
    %12 = vector.load %arg4[%c0_4, %c0_5] : memref<2x1024xf32, #tpu.memory_space<vmem>>, vector<2x1024xf32>
    %c1 = arith.constant 1 : index
    %13 = memref.load %arg1[%c1] : memref<2xf32, #tpu.memory_space<smem>>
    %c1_6 = arith.constant 1 : index
    %14 = memref.load %arg2[%c1_6] : memref<2xf32, #tpu.memory_space<smem>>
    %15 = vector.broadcast %13 : f32 to vector<2x1024xf32>
    %16 = arith.mulf %12, %15 : vector<2x1024xf32>
    %17 = math.roundeven %16 : vector<2x1024xf32>
    %cst_7 = arith.constant -1.280000e+02 : f32
    %cst_8 = arith.constant 1.270000e+02 : f32
    %18 = vector.broadcast %cst_7 : f32 to vector<2x1024xf32>
    %19 = arith.maximumf %18, %17 : vector<2x1024xf32>
    %20 = vector.broadcast %cst_8 : f32 to vector<2x1024xf32>
    %21 = arith.minimumf %20, %19 : vector<2x1024xf32>
    %22 = vector.broadcast %14 : f32 to vector<2x1024xf32>
    %23 = arith.mulf %21, %22 : vector<2x1024xf32>
    %c0_9 = arith.constant 0 : index
    %c0_10 = arith.constant 0 : index
    %24 = vector.load %arg5[%c0_9, %c0_10] : memref<2x2048xf32, #tpu.memory_space<vmem>>, vector<2x1024xf32>
    tpu.vector_store %arg5[%c0_9, %c0_10], %11 {strides = array<i32>} : memref<2x2048xf32, #tpu.memory_space<vmem>>, vector<2x1024xf32>,
    %c0_11 = arith.constant 0 : index
    %c1024 = arith.constant 1024 : index
    %25 = vector.load %arg5[%c0_11, %c1024] : memref<2x2048xf32, #tpu.memory_space<vmem>>, vector<2x1024xf32>
    tpu.vector_store %arg5[%c0_11, %c1024], %23 {strides = array<i32>} : memref<2x2048xf32, #tpu.memory_space<vmem>>, vector<2x1024xf32>,
    return
  }
  func.func @transform_0(%arg0: i32) -> i32 {
    %c0_i32 = arith.constant 0 : i32
    %c0_i32_0 = arith.constant 0 : i32
    return %c0_i32 : i32
  }
  func.func @transform_1(%arg0: i32) -> i32 {
    %c0_i32 = arith.constant 0 : i32
    %c0_i32_0 = arith.constant 0 : i32
    return %c0_i32 : i32
  }
  func.func @transform_2(%arg0: i32) -> (i32, i32) {
    %c0_i32 = arith.constant 0 : i32
    %c0_i32_0 = arith.constant 0 : i32
    return %arg0, %c0_i32 : i32, i32
  }
  func.func @transform_3(%arg0: i32) -> (i32, i32) {
    %c0_i32 = arith.constant 0 : i32
    %c0_i32_0 = arith.constant 0 : i32
    return %arg0, %c0_i32 : i32, i32
  }
  func.func @transform_4(%arg0: i32) -> (i32, i32) {
    %c0_i32 = arith.constant 0 : i32
    %c0_i32_0 = arith.constant 0 : i32
    return %arg0, %c0_i32 : i32, i32
  }
}

</mosaic_0001>

<bundles_post_ra>
// kernel: tpu_custom_call.1
= control target key start
LH: loop header
LB: loop body
LE: loop exit
PB: predicated region body
PF: predicated region fallthrough
CT: control target
= control target key end

     0   :  { %9 = vsyncpa [#allocation5], 0  ;;  %s329_s0 = inlined_call_operand.hbm [shape: f32[2], index: 0, kind: input, shape index: {}]   ;;  %s330_s1 = inlined_call_operand.hbm [shape: f32[2], index: 1, kind: input, shape index: {}]   ;;  %s331_s2 = inlined_call_operand.hbm [shape: f32[2,1024], index: 2, kind: input, shape index: {}]   ;;  %s332_s3 = inlined_call_operand.hbm [shape: f32[2,1024], index: 3, kind: input, shape index: {}]   ;;  %s333_s4 = inlined_call_operand.hbm [shape: f32[2,2048], index: 4, kind: output, shape index: {}]  }
   0x1   :  { %10 = vsyncpa [#allocation7], 0 }
   0x2   :  { %11 = vsyncpa [#allocation3], 0 }
   0x3   :  { %12 = vsyncpa [#allocation10], 0 }
   0x4   :  { %13 = vsyncpa [#allocation4], 0  ;;  %s19_s17 = sshll.u32 %s329_s0, 4  ;;  %s28_s20 = sshll.u32 %s330_s1, 4  ;;  %s20_s17 = int_to_ptr.hbm [resolvable:$true] %s19_s17  ;;  %s29_s20 = int_to_ptr.hbm [resolvable:$true] %s28_s20 }
   0x5   :  { %s272_s21 = smov [#allocation2]   ;;  %s273_s22 = smov [#allocation6]  }
   0x6   :  { %22 = dma.hbm_to_smem %s20_s17, 16, %s272_s21, [#allocation5]  }
   0x7   :  { %31 = dma.hbm_to_smem %s29_s20, 16, %s273_s22, [#allocation7]  }
   0x8   :  { %s37_s25 = sshll.u32 %s331_s2, 4  ;;  %s274_s26 = smov [#allocation8]   ;;  %s38_s25 = int_to_ptr.hbm [resolvable:$true] %s37_s25 }
   0x9   :  { %s39_s27 = sshll.u32 %s274_s26, 4  ;;  %s48_s29 = sshll.u32 %s332_s3, 4  ;;  %s40_s27 = int_to_ptr.vmem [resolvable:$true] %s39_s27  ;;  %s49_s29 = int_to_ptr.hbm [resolvable:$true] %s48_s29 }
   0xa   :  { %42 = dma.hbm_to_vmem [thread:$0]  %s38_s25, 256, %s40_s27, [#allocation3]  }
   0xb   :  { %s275_s1 = smov [#allocation9]  }
   0xc   :  { %s50_s30 = sshll.u32 %s275_s1, 4  ;;  %s51_s30 = int_to_ptr.vmem [resolvable:$true] %s50_s30 }
   0xd   :  { %53 = dma.hbm_to_vmem [thread:$0]  %s49_s29, 256, %s51_s30, [#allocation10]  }
   0xe   :  { %262 = dma.done.wait [#allocation5], 16  }
   0xf   :  { %263 = vsyncadd [#allocation5], 4294967280 }
  0x10   :  { %264 = dma.done.wait [#allocation7], 16  }
  0x11   :  { %265 = vsyncadd [#allocation7], 4294967280 }
  0x12   :  { %266 = dma.done.wait [#allocation3], 256  }
  0x13   :  { %267 = vsyncadd [#allocation3], 4294967040 }
  0x14   :  { %268 = dma.done.wait [#allocation10], 256  }
  0x15   :  { %269 = vsyncadd [#allocation10], 4294967040 }
  0x16   :  { %70 = sfence }
  0x17   :  { %s73_s2 = sld [smem:[#allocation2]]  ;;  %v71_v0 = vld [vmem:[#allocation8] sm:$0xff]  ;;  %v72_v1 = vld [vmem:[#allocation8 + $0x8] sm:$0xff]  ;;  %v87_v5 = vld [vmem:[#allocation9] sm:$0xff]  ;;  %s276_s7 = smov [#allocation11]  }
  0x18   :  { %s127_s5 = sld [smem:[#allocation2 + $0x1]]  ;;  %v88_v7 = vld [vmem:[#allocation9 + $0x8] sm:$0xff]  ;;  %s112_s8 = sshll.u32 %s276_s7, 4  ;;  %s113_s8 = int_to_ptr.vmem [resolvable:$true] %s112_s8 }
  0x19   :  { %s314_s3 = sld [smem:[#allocation6]]  ;;  %s114_s11 = sshll.u32 %s333_s4, 4  ;;  %s115_s11 = int_to_ptr.hbm [resolvable:$true] %s114_s11 }
  0x1a   :  { %s316_s6 = sld [smem:[#allocation6 + $0x1]] }
  0x1d   :  { %v75_v2 = vstv %s73_s2 }
  0x1e   :  { %v76_v3 = vmul.f32 %v75_v2, %v71_v0  ;;  %v77_v4 = vmul.f32 %v75_v2, %v72_v1  ;;  %v91_v6 = vstv %s127_s5 }
  0x1f   :  { %v92_v11 = vmul.f32 %v91_v6, %v87_v5  ;;  %v93_v15 = vmul.f32 %v91_v6, %v88_v7  ;;  %v84_v37 = vstv %s314_s3 }
  0x20   :  { %v129_v8 = vand.u32 2147483647, %v76_v3  ;;  %v131_v9 = vcvt.f32.s32 %v76_v3  ;;  %v139_v10 = vcvt.f32.s32 %v77_v4  ;;  %v134_v13 = vand.u32 2147483648, %v76_v3 }
  0x21   :  { %v137_v14 = vand.u32 2147483647, %v77_v4  ;;  %v142_v17 = vand.u32 2147483648, %v77_v4  ;;  %v147_v18 = vcvt.f32.s32 %v92_v11  ;;  %v145_v21 = vand.u32 2147483647, %v92_v11 }
  0x22   :  { %v132_v12 = vcvt.s32.f32 %v131_v9  ;;  %v140_v16 = vcvt.s32.f32 %v139_v10  ;;  %vm318_vm0 = vcmp.lt.f32.partialorder %v129_v8, 8388608.0  ;;  %v155_v22 = vcvt.f32.s32 %v93_v15 }
  0x23   :  { %v148_v24 = vcvt.s32.f32 %v147_v18  ;;  %v150_v25 = vand.u32 2147483648, %v92_v11  ;;  %v153_v26 = vand.u32 2147483647, %v93_v15  ;;  %vm138_vm1 = vcmp.lt.f32.partialorder %v137_v14, 8388608.0 }
  0x24   :  { %v133_v20 = vand.u32 2147483647, %v132_v12  ;;  %v141_v23 = vand.u32 2147483647, %v140_v16  ;;  %v156_v28 = vcvt.s32.f32 %v155_v22  ;;  %v158_v29 = vand.u32 2147483648, %v93_v15 }
  0x25   :  { %v149_v31 = vand.u32 2147483647, %v148_v24  ;;  %vm146_vm2 = vcmp.lt.f32.partialorder %v145_v21, 8388608.0  ;;  %vm154_vm3 = vcmp.lt.f32.partialorder %v153_v26, 8388608.0  ;;  %v100_v46 = vstv %s316_s6 }
  0x26   :  { %v135_v27 = vor.u32 %v134_v13, %v133_v20  ;;  %v143_v30 = vor.u32 %v142_v17, %v141_v23  ;;  %v157_v33 = vand.u32 2147483647, %v156_v28 }
  0x27   :  { %v151_v36 = vor.u32 %v150_v25, %v149_v31 }
  0x28   :  { %v136_v32 = vsel %vm318_vm0, %v135_v27, %v76_v3  ;;  %v144_v35 = vsel %vm138_vm1, %v143_v30, %v77_v4  ;;  %v159_v39 = vor.u32 %v158_v29, %v157_v33 }
  0x29   :  { %v80_v34 = vmax.f32 %v136_v32, -128.0  ;;  %v81_v38 = vmax.f32 %v144_v35, -128.0  ;;  %v152_v41 = vsel %vm146_vm2, %v151_v36, %v92_v11 }
  0x2a   :  { %v96_v43 = vmax.f32 %v152_v41, -128.0  ;;  %v160_v44 = vsel %vm154_vm3, %v159_v39, %v93_v15 }
  0x2b   :  { %v82_v40 = vmin.f32 %v80_v34, 127.0  ;;  %v83_v42 = vmin.f32 %v81_v38, 127.0  ;;  %v97_v47 = vmax.f32 %v160_v44, -128.0 }
  0x2c   :  { %v98_v49 = vmin.f32 %v96_v43, 127.0 }
  0x2d   :  { %v85_v45 = vmul.f32 %v84_v37, %v82_v40  ;;  %v86_v48 = vmul.f32 %v84_v37, %v83_v42  ;;  %v99_v50 = vmin.f32 %v97_v47, 127.0 }
  0x2e   :  { %v101_v51 = vmul.f32 %v100_v46, %v98_v49 }
  0x2f   :  { %103 = vst [vmem:[#allocation11] sm:$0xff] %v85_v45  ;;  %v102_v52 = vmul.f32 %v100_v46, %v99_v50 }
  0x30   :  { %104 = vst [vmem:[#allocation11 + $0x8] sm:$0xff] %v86_v48 }
  0x31   :  { %105 = vst [vmem:[#allocation11 + $0x10] sm:$0xff] %v101_v51 }
  0x32   :  { %106 = vst [vmem:[#allocation11 + $0x18] sm:$0xff] %v102_v52 }
  0x33   :  { %117 = dma.vmem_to_hbm [thread:$0]  %s113_s8, 512, %s115_s11, [#allocation4]  }
  0x34   :  { %270 = dma.done.wait [#allocation4], 512  }
  0x35   :  { %271 = vsyncadd [#allocation4], 4294966784 }
  0x36   :  { %122 = vsyncpa [#allocation3], 1 }
  0x37   :  { %123 = vsyncpa [#allocation10], 1 }
  0x38   :  { %124 = vsyncpa [#allocation4], 1 }
  0x39   :  { %125 = vsyncpa [#allocation5], 1 }
  0x3a   :  { %126 = vsyncpa [#allocation7], 1 }

</bundles_post_ra>
